<compile_context>
chip_gen: v5e
topology: v5e:2x2
jax: 0.10.0
libtpu: 0.0.40
codegen_flags: <defaults>
</compile_context>

<pallas_src>
import jax
import jax.numpy as jnp
from jax.experimental import pallas as pl
from jax.experimental.pallas import tpu as pltpu


# ----------------------------- Pallas kernels -----------------------------

def _interaction_kernel(x_ref, wkq_ref, inter_ref, m_ref, s_ref, acc_ref):
    # grid = (N, num_L_tiles); L axis is the sequential reduction with online-softmax state in VMEM.
    li = pl.program_id(1)
    ck = wkq_ref.shape[0] - 1          # last row of the fused [Wk; Wq] weight is Wq

    @pl.when(li == 0)
    def _init():
        m_ref[...] = jnp.full_like(m_ref, -jnp.inf)
        s_ref[...] = jnp.zeros_like(s_ref)
        acc_ref[...] = jnp.zeros_like(acc_ref)

    xt = x_ref[0]                                                           # (C, tL) f32
    kq = jnp.dot(wkq_ref[...], xt, preferred_element_type=jnp.float32)      # (Ck+1, tL)
    k = kq[:ck, :]                                                          # (Ck, tL)
    q = kq[ck:ck + 1, :]                                                    # (1, tL)

    m_prev = m_ref[...]                                                     # (1, 1)
    m_new = jnp.maximum(m_prev, jnp.max(q, axis=1, keepdims=True))          # (1, 1)
    alpha = jnp.exp(m_prev - m_new)                                         # (1, 1)
    p = jnp.exp(q - m_new)                                                  # (1, tL)
    s_ref[...] = alpha * s_ref[...] + jnp.sum(p, axis=1, keepdims=True)
    # L-reduction of p*k on the MXU: contract k(Ck,tL) with p(1,tL) over tL -> (Ck, 1)
    pk = jax.lax.dot_general(k, p, dimension_numbers=(((1,), (1,)), ((), ())),
                             preferred_element_type=jnp.float32)
    acc_ref[...] = alpha * acc_ref[...] + pk
    m_ref[...] = m_new

    @pl.when(li == pl.num_programs(1) - 1)
    def _finalize():
        inter_ref[0] = (acc_ref[...] / s_ref[...]).astype(inter_ref.dtype)  # (Ck, 1)


def _apply_kernel(x_ref, wf_ref, shift_ref, o_ref):
    # out(C, tL) = Wfold[n] @ x(C, tL) + bn_shift   (f32 operands, lane-dense output tile)
    y = jnp.dot(wf_ref[0], x_ref[0], preferred_element_type=jnp.float32)    # (C, tL)
    o_ref[0] = (y + shift_ref[...]).astype(o_ref.dtype)


# ----------------------------- tiling / VMEM sizing -----------------------------

def _pick_tile_l(L, C, bytes_per_elem=4, max_tile_bytes=4 << 20):
    """Whole-L blocks when they fit; otherwise the largest 128-multiple divisor of L that fits."""
    if L * C * bytes_per_elem <= max_tile_bytes:
        return L
    best = 0
    t = 128
    while t <= L:
        if L % t == 0 and t * C * bytes_per_elem <= max_tile_bytes:
            best = t
        t += 128
    return best if best > 0 else L


def _vmem_limit_bytes(per_step_bytes):
    # 2x for double buffering + headroom; keep well under v7x's 64 MiB per-TC VMEM.
    need = 2 * per_step_bytes + (4 << 20)
    return int(min(max(need, 16 << 20), 40 << 20))


# ----------------------------- pallas_call wrappers -----------------------------

def _interaction_call(x_ncl, wkq, tile_l, vmem_limit):
    N, C, L = x_ncl.shape
    ckp1 = wkq.shape[0]
    num_l = L // tile_l
    return pl.pallas_call(
        _interaction_kernel,
        out_shape=jax.ShapeDtypeStruct((N, ckp1 - 1, 1), jnp.float32),
        grid_spec=pltpu.PrefetchScalarGridSpec(
            num_scalar_prefetch=0,
            grid=(N, num_l),
            in_specs=[
                pl.BlockSpec((1, C, tile_l), lambda n, l: (n, 0, l)),
                pl.BlockSpec((ckp1, C), lambda n, l: (0, 0)),
            ],
            out_specs=pl.BlockSpec((1, ckp1 - 1, 1), lambda n, l: (n, 0, 0)),
            scratch_shapes=[
                pltpu.VMEM((1, 1), jnp.float32),          # running max of query logits
                pltpu.VMEM((1, 1), jnp.float32),          # running sum-exp
                pltpu.VMEM((ckp1 - 1, 1), jnp.float32),   # softmax-weighted key accumulator
            ],
        ),
        compiler_params=pltpu.CompilerParams(
            dimension_semantics=("parallel", "arbitrary"),
            vmem_limit_bytes=vmem_limit),
    )(x_ncl, wkq)


def _apply_call(x_ncl, wfold, shift_col, tile_l, vmem_limit):
    N, C, L = x_ncl.shape
    num_l = L // tile_l
    return pl.pallas_call(
        _apply_kernel,
        out_shape=jax.ShapeDtypeStruct((N, C, L), jnp.float32),
        grid_spec=pltpu.PrefetchScalarGridSpec(
            num_scalar_prefetch=0,
            grid=(N, num_l),
            in_specs=[
                pl.BlockSpec((1, C, tile_l), lambda n, l: (n, 0, l)),
                pl.BlockSpec((1, C, C), lambda n, l: (n, 0, 0)),
                pl.BlockSpec((C, 1), lambda n, l: (0, 0)),
            ],
            out_specs=pl.BlockSpec((1, C, tile_l), lambda n, l: (n, l, 0) if False else (n, 0, l)),
        ),
        compiler_params=pltpu.CompilerParams(
            dimension_semantics=("parallel", "parallel"),
            vmem_limit_bytes=vmem_limit),
    )(x_ncl, wfold, shift_col)


# ----------------------------- parameters / forward -----------------------------

def init_params(key, inplanes, planes):
    inter = planes // 2
    ks = jax.random.split(key, 9)
    f32 = jnp.float32
    p = {}
    p["Wv"] = (0.2 * jax.random.normal(ks[0], (planes, inplanes))).astype(f32)
    p["Wk"] = (0.2 * jax.random.normal(ks[1], (inter, inplanes))).astype(f32)
    p["Wq"] = (0.2 * jax.random.normal(ks[2], (1, inplanes))).astype(f32)
    p["Wc"] = (0.2 * jax.random.normal(ks[3], (planes, inter))).astype(f32)
    p["Wd"] = (0.2 * jax.random.normal(ks[4], (inplanes, planes + inplanes))).astype(f32)
    p["bn_g"] = (1.0 + 0.1 * jax.random.normal(ks[5], (inplanes,))).astype(f32)
    p["bn_b"] = (0.1 * jax.random.normal(ks[6], (inplanes,))).astype(f32)
    p["bn_m"] = (0.1 * jax.random.normal(ks[7], (inplanes,))).astype(f32)
    p["bn_v"] = (0.5 + 0.2 * jnp.abs(jax.random.normal(ks[8], (inplanes,)))).astype(f32)
    return p


def mfa_forward(x, params, tile_l=None):
    """x: (N, inplanes, T, V) float32 NCHW.  Returns (N, inplanes, T, V) float32 (eval-mode BN)."""
    N, C, T, V = x.shape
    P = params["Wv"].shape[0]
    L = T * V
    if tile_l is None:
        tile_l = _pick_tile_l(L, C)
    assert L % tile_l == 0 and (tile_l == L or tile_l % 128 == 0), (L, tile_l)

    x_ncl = x.reshape(N, C, L)                       # free: native layout, no transpose, no cast

    # conv_k / conv_q fused into one (Ck+1, C) weight; the last row is Wq.
    wkq = jnp.concatenate([params["Wk"], params["Wq"]], axis=0).astype(jnp.float32)

    tile_bytes = C * tile_l * 4
    vmem1 = _vmem_limit_bytes(tile_bytes)            # kernel 1: x tile (+ tiny weight / output)
    vmem2 = _vmem_limit_bytes(2 * tile_bytes)        # kernel 2: x tile + out tile

    # ---- kernel 1: softmax(query)-weighted key reduction -> interaction (N, Ck) ----
    inter = _interaction_call(x_ncl, wkq, tile_l, vmem1)[..., 0]          # (N, Ck)

    # ---- tiny per-batch fold (plain JAX): sigmoid(conv_c) + conv_v*att -> conv_down -> BN fold ----
    hi = jax.lax.Precision.HIGHEST
    att = jax.nn.sigmoid(jnp.einsum("nk,pk->np", inter, params["Wc"], precision=hi))   # (N, P)
    wd_a = params["Wd"][:, :P]                                            # (C, P)  multiplies attended
    wd_x = params["Wd"][:, P:]                                            # (C, C)  multiplies x
    scale = params["bn_g"] / jnp.sqrt(params["bn_v"] + 1e-5)
    shift = params["bn_b"] - params["bn_m"] * scale
    wfold = jnp.einsum("cp,np,pk->nck", wd_a, att, params["Wv"], precision=hi) + wd_x[None]
    wfold = scale[None, :, None] * wfold                                  # (N, C, C)

    # ---- kernel 2: out = Wfold[n] @ x + bn_shift ----
    out_ncl = _apply_call(x_ncl, wfold, shift.reshape(C, 1), tile_l, vmem2)
    return out_ncl.reshape(N, C, T, V)


# ----------------------------- pure-JAX reference (for verification) -----------------------------

def mfa_reference(x, p):
    hi = jax.lax.Precision.HIGHEST
    N, C, T, V = x.shape
    P = p["Wv"].shape[0]
    Ck = p["Wk"].shape[0]

    value = jnp.einsum("nctv,pc->nptv", x, p["Wv"], precision=hi)               # conv_v
    key = jnp.einsum("nctv,pc->nptv", x, p["Wk"], precision=hi).reshape(N, Ck, T * V)
    query = jnp.einsum("nctv,pc->nptv", x, p["Wq"], precision=hi).reshape(N, 1, T * V)
    q_sm = jax.nn.softmax(query, axis=2)
    inter = jnp.einsum("ncl,nl->nc", key, q_sm[:, 0, :], precision=hi)          # (N, Ck)
    logits = jnp.einsum("nc,pc->np", inter, p["Wc"], precision=hi)              # conv_c
    att = jax.nn.sigmoid(logits)                                                # (N, P)
    attended = value * att[:, :, None, None]
    cat = jnp.concatenate([attended, x], axis=1)
    down = jnp.einsum("nctv,dc->ndtv", cat, p["Wd"], precision=hi)              # conv_down
    scale = p["bn_g"] / jnp.sqrt(p["bn_v"] + 1e-5)
    shift = p["bn_b"] - p["bn_m"] * scale
    return down * scale[None, :, None, None] + shift[None, :, None, None]


# ----------------------------- main -----------------------------

if __name__ == "__main__":
    N, INPLANES, PLANES, T, V = 2, 8, 16, 16, 16          # L = T*V = 256

    key = jax.random.PRNGKey(0)
    kx, kp = jax.random.split(key)
    x = jax.random.normal(kx, (N, INPLANES, T, V), dtype=jnp.float32)
    params = init_params(kp, INPLANES, PLANES)

    ref = mfa_reference(x, params)

    # Exercise both paths: whole-L blocks (grid (N,1)) and the multi-tile online-softmax path.
    for tl in (None, 128):
        out = jax.block_until_ready(mfa_forward(x, params, tile_l=tl))
        assert out.shape == (N, INPLANES, T, V), out.shape
        err = float(jnp.max(jnp.abs(out - ref)))
        assert jnp.allclose(out, ref, atol=2e-2, rtol=2e-2), (tl, err)

    print("KERNEL_OK")
</pallas_src>

<mosaic_0001>
module attributes {stable_mosaic.version = 11 : i64} {
  func.func @_interaction_kernel(%arg0: i32, %arg1: i32, %arg2: memref<1x8x256xf32, #tpu.memory_space<vmem>>, %arg3: memref<9x8xf32, #tpu.memory_space<vmem>>, %arg4: memref<1x8x1xf32, #tpu.memory_space<vmem>>, %arg5: memref<1x1xf32, #tpu.memory_space<vmem>>, %arg6: memref<1x1xf32, #tpu.memory_space<vmem>>, %arg7: memref<8x1xf32, #tpu.memory_space<vmem>>) attributes {dimension_semantics = [#tpu.dimension_semantics<parallel>, #tpu.dimension_semantics<arbitrary>], iteration_bounds = array<i64: 2, 1>, scalar_prefetch = 0 : i64, scratch_operands = 3 : i64, tpu.core_type = #tpu.core_type<tc>, window_params = [{transform_indices = @transform_0, window_bounds = array<i64: 1, 8, 256>}, {pipeline_mode = #tpu.pipeline_mode<synchronous>, transform_indices = @transform_1, window_bounds = array<i64: 9, 8>}, {transform_indices = @transform_2, window_bounds = array<i64: 1, 8, 1>}]} {
    %c0_i32 = arith.constant 0 : i32
    %0 = arith.cmpi eq, %arg1, %c0_i32 : i32
    %1 = arith.extui %0 : i1 to i32
    %c0_i32_0 = arith.constant 0 : i32
    %2 = arith.cmpi ne, %1, %c0_i32_0 : i32
    scf.if %2 {
      %cst_22 = arith.constant 0xFF800000 : f32
      %34 = vector.broadcast %cst_22 : f32 to vector<1x1xf32>
      %c0_23 = arith.constant 0 : index
      %c0_24 = arith.constant 0 : index
      %35 = vector.load %arg5[%c0_23, %c0_24] : memref<1x1xf32, #tpu.memory_space<vmem>>, vector<1x1xf32>
      tpu.vector_store %arg5[%c0_23, %c0_24], %34 {strides = array<i32>} : memref<1x1xf32, #tpu.memory_space<vmem>>, vector<1x1xf32>,
      %cst_25 = arith.constant 0.000000e+00 : f32
      %36 = vector.broadcast %cst_25 : f32 to vector<1x1xf32>
      %c0_26 = arith.constant 0 : index
      %c0_27 = arith.constant 0 : index
      %37 = vector.load %arg6[%c0_26, %c0_27] : memref<1x1xf32, #tpu.memory_space<vmem>>, vector<1x1xf32>
      tpu.vector_store %arg6[%c0_26, %c0_27], %36 {strides = array<i32>} : memref<1x1xf32, #tpu.memory_space<vmem>>, vector<1x1xf32>,
      %cst_28 = arith.constant 0.000000e+00 : f32
      %38 = vector.broadcast %cst_28 : f32 to vector<8x1xf32>
      %c0_29 = arith.constant 0 : index
      %c0_30 = arith.constant 0 : index
      %39 = vector.load %arg7[%c0_29, %c0_30] : memref<8x1xf32, #tpu.memory_space<vmem>>, vector<8x1xf32>
      tpu.vector_store %arg7[%c0_29, %c0_30], %38 {strides = array<i32>} : memref<8x1xf32, #tpu.memory_space<vmem>>, vector<8x1xf32>,
    } else {
    }
    %c0 = arith.constant 0 : index
    %c0_1 = arith.constant 0 : index
    %c0_2 = arith.constant 0 : index
    %3 = vector.load %arg2[%c0, %c0_1, %c0_2] : memref<1x8x256xf32, #tpu.memory_space<vmem>>, vector<1x8x256xf32>
    %4 = vector.shape_cast %3 : vector<1x8x256xf32> to vector<8x256xf32>
    %c0_3 = arith.constant 0 : index
    %c0_4 = arith.constant 0 : index
    %5 = vector.load %arg3[%c0_3, %c0_4] : memref<9x8xf32, #tpu.memory_space<vmem>>, vector<9x8xf32>
    %cst = arith.constant dense<0.000000e+00> : vector<9x256xf32>
    %6 = tpu.matmul %5, %4, %cst {dimension_numbers = #tpu.dot_dimension_numbers<[1], [0], [0], [1], [0, 0, 1, 1], [], []>} : vector<9x8xf32>, vector<8x256xf32>, vector<9x256xf32> -> vector<9x256xf32>
    %7 = vector.extract_strided_slice %6 {offsets = [0, 0], sizes = [8, 256], strides = [1, 1]} : vector<9x256xf32> to vector<8x256xf32>
    %8 = vector.extract_strided_slice %6 {offsets = [8, 0], sizes = [1, 256], strides = [1, 1]} : vector<9x256xf32> to vector<1x256xf32>
    %c0_5 = arith.constant 0 : index
    %c0_6 = arith.constant 0 : index
    %9 = vector.load %arg5[%c0_5, %c0_6] : memref<1x1xf32, #tpu.memory_space<vmem>>, vector<1x1xf32>
    %cst_7 = arith.constant dense<0xFF800000> : vector<1xf32>
    %10 = vector.multi_reduction <maximumf>, %8, %cst_7 [1] : vector<1x256xf32> to vector<1xf32>
    %11 = vector.shape_cast %10 : vector<1xf32> to vector<1x1xf32>
    %12 = arith.maximumf %9, %11 : vector<1x1xf32>
    %13 = arith.subf %9, %12 : vector<1x1xf32>
    %14 = math.exp %13 : vector<1x1xf32>
    %15 = vector.broadcast %12 : vector<1x1xf32> to vector<1x256xf32>
    %16 = arith.subf %8, %15 : vector<1x256xf32>
    %17 = math.exp %16 : vector<1x256xf32>
    %c0_8 = arith.constant 0 : index
    %c0_9 = arith.constant 0 : index
    %18 = vector.load %arg6[%c0_8, %c0_9] : memref<1x1xf32, #tpu.memory_space<vmem>>, vector<1x1xf32>
    %19 = arith.mulf %14, %18 : vector<1x1xf32>
    %cst_10 = arith.constant dense<0.000000e+00> : vector<1xf32>
    %20 = vector.multi_reduction <add>, %17, %cst_10 [1] : vector<1x256xf32> to vector<1xf32>
    %21 = vector.shape_cast %20 : vector<1xf32> to vector<1x1xf32>
    %22 = arith.addf %19, %21 : vector<1x1xf32>
    %c0_11 = arith.constant 0 : index
    %c0_12 = arith.constant 0 : index
    %23 = vector.load %arg6[%c0_11, %c0_12] : memref<1x1xf32, #tpu.memory_space<vmem>>, vector<1x1xf32>
    tpu.vector_store %arg6[%c0_11, %c0_12], %22 {strides = array<i32>} : memref<1x1xf32, #tpu.memory_space<vmem>>, vector<1x1xf32>,
    %cst_13 = arith.constant dense<0.000000e+00> : vector<8x1xf32>
    %24 = tpu.matmul %7, %17, %cst_13 {dimension_numbers = #tpu.dot_dimension_numbers<[1], [1], [0], [0], [0, 0, 1, 0], [], []>} : vector<8x256xf32>, vector<1x256xf32>, vector<8x1xf32> -> vector<8x1xf32>
    %c0_14 = arith.constant 0 : index
    %c0_15 = arith.constant 0 : index
    %25 = vector.load %arg7[%c0_14, %c0_15] : memref<8x1xf32, #tpu.memory_space<vmem>>, vector<8x1xf32>
    %26 = vector.broadcast %14 : vector<1x1xf32> to vector<8x1xf32>
    %27 = arith.mulf %26, %25 : vector<8x1xf32>
    %28 = arith.addf %27, %24 : vector<8x1xf32>
    %c0_16 = arith.constant 0 : index
    %c0_17 = arith.constant 0 : index
    %29 = vector.load %arg7[%c0_16, %c0_17] : memref<8x1xf32, #tpu.memory_space<vmem>>, vector<8x1xf32>
    tpu.vector_store %arg7[%c0_16, %c0_17], %28 {strides = array<i32>} : memref<8x1xf32, #tpu.memory_space<vmem>>, vector<8x1xf32>,
    %c0_18 = arith.constant 0 : index
    %c0_19 = arith.constant 0 : index
    %30 = vector.load %arg5[%c0_18, %c0_19] : memref<1x1xf32, #tpu.memory_space<vmem>>, vector<1x1xf32>
    tpu.vector_store %arg5[%c0_18, %c0_19], %12 {strides = array<i32>} : memref<1x1xf32, #tpu.memory_space<vmem>>, vector<1x1xf32>,
    %c0_i32_20 = arith.constant 0 : i32
    %31 = arith.cmpi eq, %arg1, %c0_i32_20 : i32
    %32 = arith.extui %31 : i1 to i32
    %c0_i32_21 = arith.constant 0 : i32
    %33 = arith.cmpi ne, %32, %c0_i32_21 : i32
    scf.if %33 {
      %c0_22 = arith.constant 0 : index
      %c0_23 = arith.constant 0 : index
      %34 = vector.load %arg7[%c0_22, %c0_23] : memref<8x1xf32, #tpu.memory_space<vmem>>, vector<8x1xf32>
      %c0_24 = arith.constant 0 : index
      %c0_25 = arith.constant 0 : index
      %35 = vector.load %arg6[%c0_24, %c0_25] : memref<1x1xf32, #tpu.memory_space<vmem>>, vector<1x1xf32>
      %36 = vector.broadcast %35 : vector<1x1xf32> to vector<8x1xf32>
      %37 = arith.divf %34, %36 : vector<8x1xf32>
      %c0_26 = arith.constant 0 : index
      %c0_27 = arith.constant 0 : index
      %c0_28 = arith.constant 0 : index
      %38 = vector.load %arg4[%c0_26, %c0_27, %c0_28] : memref<1x8x1xf32, #tpu.memory_space<vmem>>, vector<1x8x1xf32>
      %39 = vector.shape_cast %38 : vector<1x8x1xf32> to vector<8x1xf32>
      %40 = vector.shape_cast %37 : vector<8x1xf32> to vector<1x8x1xf32>
      tpu.vector_store %arg4[%c0_26, %c0_27, %c0_28], %40 {strides = array<i32>} : memref<1x8x1xf32, #tpu.memory_space<vmem>>, vector<1x8x1xf32>,
    } else {
    }
    return
  }
  func.func @transform_0(%arg0: i32, %arg1: i32) -> (i32, i32, i32) {
    %c0_i32 = arith.constant 0 : i32
    %c0_i32_0 = arith.constant 0 : i32
    return %arg0, %c0_i32, %arg1 : i32, i32, i32
  }
  func.func @transform_1(%arg0: i32, %arg1: i32) -> (i32, i32) {
    %c0_i32 = arith.constant 0 : i32
    %c0_i32_0 = arith.constant 0 : i32
    %c0_i32_1 = arith.constant 0 : i32
    return %c0_i32, %c0_i32_0 : i32, i32
  }
  func.func @transform_2(%arg0: i32, %arg1: i32) -> (i32, i32, i32) {
    %c0_i32 = arith.constant 0 : i32
    %c0_i32_0 = arith.constant 0 : i32
    %c0_i32_1 = arith.constant 0 : i32
    return %arg0, %c0_i32, %c0_i32_0 : i32, i32, i32
  }
}

</mosaic_0001>

<bundles_post_ra>
// kernel: tpu_custom_call.1
= control target key start
LH: loop header
LB: loop body
LE: loop exit
PB: predicated region body
PF: predicated region fallthrough
CT: control target
= control target key end

     0   :  { %7 = vsyncpa [#allocation6], 0  ;;  %s690_s0 = inlined_call_operand.hbm [shape: f32[2,8,256], index: 0, kind: input, shape index: {}]   ;;  %s691_s1 = inlined_call_operand.vmem [shape: f32[9,8], index: 1, kind: input, shape index: {}]   ;;  %s692_s2 = inlined_call_operand.vmem [shape: f32[2,8,1], index: 2, kind: output, shape index: {}]  }
   0x1   :  { %9 = vsyncpa [#allocation6 + $0x1], 0  ;;  %s581_s9 = smov 0   ;;  %s583_s10 = smov 0  }
   0x2   :  { %s585_s11 = smov 0   ;;  %s587_s12 = smov 0  }
   0x3   :  { %s589_s13 = smov 0   ;;  %s591_s14 = smov 0  }
   0x4 LB: > { %s394_s15 = sadd.s32 4294967295, %s561_s14   ;;  %s27_s16 = sadd.s32 1, %s557_s13  ;;  %s561_s14 = sphi %s591_s14, %s15_s14   ;;  %s557_s13 = sphi %s589_s13, %s699_s13   ;;  %s553_s12 = sphi %s587_s12, %s698_s12   ;;  %s549_s11 = sphi %s585_s11, %s697_s11   ;;  %s545_s10 = sphi %s583_s10, %s696_s10   ;;  %s541_s9 = sphi %s581_s9, %s695_s9  }
   0x5   : > { %p29_p0 = scmp.ge.s32.totalorder %s27_s16, 2  ;;  %s36_s17 = sadd.s32 1, %s549_s11 }
   0x6   : > { %p43_p1 = scmp.ne.s32.totalorder %s549_s11, %s545_s10  ;;  %p44_p2 = scmp.eq.s32.totalorder %s561_s14, 0 }
   0x7   : > { %s701_s16 = smov (%p29_p0, %s27_s16), 0  ;;  %p49_p4 = scmp.ne.s32.totalorder %s545_s10, %s541_s9 }
   0x8   : > { %p617_p3 = por %p44_p2, %p43_p1  ;;  %s31_s19 = ssub.s32 %s557_s13, %s701_s16 }
   0x9   : > { %p50_p5 = scmp.eq.s32.totalorder %s394_s15, 0  ;;  %p34_p6 = scmp.eq.s32.totalorder %s31_s19, 0 }
   0xa   : > { %p419_p8 = scmp.lt.s32.totalorder %s561_s14, 2  ;;  %s123_s22 = sand.u32 1, %s549_s11  }
   0xb   : > { %p624_p7 = por %p50_p5, %p49_p4  ;;  %s410_s23 = sshll.u32 %s557_s13, 4 }
   0xc   : > { %s630_s21 = scalar_select %p34_p6, %s549_s11, %s36_s17  }
   0xd   : > { %s398_s24 = sshll.u32 %s123_s22, 4  ;;  %s134_s27 = scalar_lea.hbm %s690_s0, %s410_s23 }
   0xe   : > { %s136_s28 = sshll.u32 %s134_s27, 4  ;;  %s127_s29 = scalar_lea.vmem [#allocation5], %s398_s24  ;;  %s137_s28 = int_to_ptr.hbm [resolvable:$true] %s136_s28 }
   0xf   : > { %s138_s30 = sshll.u32 %s127_s29, 4  ;;  %p416_p9 = pnand %p419_p8, %p617_p3  ;;  %s139_s30 = int_to_ptr.vmem [resolvable:$true] %s138_s30 }
  0x10   : > { %p401_p10 = scmp.ge.s32.totalorder %s561_s14, 1  ;;  %p143_p11 = scmp.lt.s32.totalorder %s561_s14, 3 }
  0x11   : > { %s124_s3 = scalar_lea.sflag [#allocation6], %s123_s22 }
  0x12   : > { %418 = dma.hbm_to_vmem [thread:$0]  (!%p416_p9), %s137_s28, 256, %s139_s30, %s124_s3  }
  0x13   : > { %p144_p12 = pnand %p401_p10, %p143_p11 }
  0x14   : > { %s149_s4 = sand.u32 (!%p144_p12), 1, %s545_s10  }
  0x15   : > { %147 = sbr.rel (%p144_p12) target bundleno = 560 (0x230), region = 28  ;;  %s402_s5 = sshll.u32 (!%p144_p12), %s149_s4, 4 }
  0x16   : > { %s150_s6 = scalar_lea.sflag (!%p144_p12), [#allocation6], %s149_s4  ;;  %s153_s7 = scalar_lea.vmem (!%p144_p12), [#allocation5], %s402_s5 }
  0x1a   : > { %536 = dma.done.wait (%p624_p7), %s150_s6, 256  }
  0x1b   : > { %538 = vsyncadd (%p624_p7), %s150_s6, 4294967040  ;;  %vm192_vm0 = vcmask 64512   ;;  %v188_v0 = vld [vmem:[%s153_s7] sm:$0xff]  ;;  %v189_v1 = vld [vmem:[%s153_s7 + $0x8] sm:$0xff]  ;;  %vm183_vm1 = vcmask 0   ;;  %v563_v3 = vmov -inf  }
  0x1c   : > { %v191_v2 = vld [vmem:[%s691_s1 + $0x8] sm:$0x1]  ;;  %411 = vmatpush.msra.mxu2 %v188_v0  ;;  %412 = vmatpush.msra.mxu3 %v189_v1  ;;  %184 = vst.msk [vmem:[#allocation2] sm:$0x1] %vm183_vm1, %v563_v3  ;;  %vm246_vm2 = vcmask 1040384   ;;  %v564_v9 = vmov 0  }
  0x1d   : > { %405 = vmatmul.msk.f32.vlgmr.msra.gmra.mxu2 %vm192_vm0, %v191_v2  ;;  %407 = vmatmul.msk.f32.vlgmr.msra.gmra.mxu3 %vm192_vm0, %v191_v2  ;;  %v190_v10 = vld [vmem:[%s691_s1] sm:$0xff]  ;;  %v565_v11 = vmov 0.0   ;;  %vm186_vm3 = vcmask 7168   ;;  %p175_p13 = scmp.lt.s32.totalorder %s553_s12, 1 }
  0x1e   : > { %214 = vmatpush.msra.mxu0 %v188_v0  ;;  %237 = vmatpush.msra.mxu1 %v189_v1  ;;  %185 = vst.msk [vmem:[#allocation3] sm:$0x1] %vm183_vm1, %v565_v11 }
  0x1f   : > { %471 = vset.pattern.permute.xlu0 %v564_v9  ;;  %404 = vmatmul.msk.f32.vlgmr.msra.gmra.mxu0 %vm192_vm0, %v190_v10  ;;  %187 = vst.msk [vmem:[#allocation4] sm:$0xff] %vm186_vm3, %v565_v11  ;;  %s703_s12 = smov (!%p175_p13, %s553_s12), 1 }
  0x20   : > { %406 = vmatmul.msk.f32.vlgmr.msra.gmra.mxu1 %vm192_vm0, %v190_v10  ;;  %s403_s18 = sshll.u32 %s703_s12, 3 }
  0x21   : > { %s178_s22 = scalar_lea.vmem %s692_s2, %s403_s18 }
  0x23   : > { %v245_v12 = vld [vmem:[#allocation2] sm:$0x1] }
  0x25   : > { %v268_v36 = vld [vmem:[#allocation3] sm:$0x1] }
  0x26   : > { %v285_v41 = vld [vmem:[#allocation4] sm:$0xff] }
  0x9c   : > { %v216_v29 = vpop.f32.mrf.mxu0 }
  0x9d   : > { %v239_v30 = vpop.f32.mrf.mxu1 }
  0xa0   : > { %v219_v4 = vpop.f32.mrf.mxu2  ;;  %v242_v5 = vpop.f32.mrf.mxu3 }
  0xa1   : > { %v247_v6 = vsel %vm246_vm2, %v219_v4, -inf  ;;  %v248_v7 = vsel %vm246_vm2, %v242_v5, -inf }
  0xa2   : > { %v249_v8 = vmax.f32 %v247_v6, %v248_v7 }
  0xa4   : > { %250 = vmax.xlane.f32.xlu0 %v249_v8 }
 0x117   : > { %v251_v13 = vpop.xlane.xlu0 %250 }
 0x118   : > { %v252_v14 = vmax.f32 %v245_v12, %v251_v13 }
 0x11a   : > { %v253_v15 = vsub.f32 %v245_v12, %v252_v14  ;;  %293 = vst.msk [vmem:[#allocation2] sm:$0x1] %vm183_vm1, %v252_v14  ;;  %258 = vperm.xlu0 %471, %v252_v14  }
 0x11c   : > { %v254_v34 = vmul.f32 1.442695, %v253_v15 }
 0x18c   : > { %v259_v16 = vpop.permute.xlu0 %258 }
 0x18d   : > { %v261_v17 = vperm.slane %v259_v16, 0 }
 0x18f   : > { %v262_v18 = vsub.f32 %v219_v4, %v261_v17  ;;  %v263_v19 = vsub.f32 %v242_v5, %v261_v17 }
 0x191   : > { %v264_v20 = vmul.f32 1.442695, %v262_v18  ;;  %v266_v21 = vmul.f32 1.442695, %v263_v19 }
 0x193   : > { %473 = vpow2.f32 %v264_v20 }
 0x194   : > { %475 = vpow2.f32 %v266_v21 }
 0x195   : > { %477 = vpow2.f32 %v254_v34 }
 0x199   : > { %v474_v22 = vpop.eup %473 }
 0x19a   : > { %v476_v23 = vpop.eup %475  ;;  %v270_v24 = vsel %vm246_vm2, %v474_v22, 0.0  ;;  %v278_v26 = vperm.slane %v474_v22, 0 }
 0x19b   : > { %v271_v25 = vsel %vm246_vm2, %v476_v23, 0.0  ;;  %v279_v27 = vperm.slane %v476_v23, 0  ;;  %v478_v35 = vpop.eup %477 }
 0x19c   : > { %v272_v28 = vadd.f32 %v271_v25, %v270_v24  ;;  %v280_v31 = vmul.f32 %v278_v26, %v216_v29  ;;  %v269_v37 = vmul.f32 %v478_v35, %v268_v36  ;;  %v287_v40 = vperm.slane %v478_v35, 0 }
 0x19d   : > { %v281_v32 = vmul.f32 %v279_v27, %v239_v30 }
 0x19e   : > { %273 = vadd.xlane.f32.xlu1 %v272_v28  ;;  %v289_v42 = vmul.f32 %v287_v40, %v285_v41 }
 0x19f   : > { %v282_v33 = vadd.f32 %v281_v32, %v280_v31 }
 0x1a6   : > { %283 = vadd.xlane.f32.xlu1 %v282_v33 }
 0x211   : > { %v274_v38 = vpop.xlane.xlu1 %273 }
 0x212   : > { %v275_v39 = vadd.f32 %v274_v38, %v269_v37 }
 0x214   : > { %277 = vst.msk [vmem:[#allocation3] sm:$0x1] %vm183_vm1, %v275_v39 }
 0x219   : > { %v284_v43 = vpop.xlane.xlu1 %283 }
 0x21a   : > { %v290_v44 = vadd.f32 %v289_v42, %v284_v43 }
 0x21b   : > { %v472_v45 = vld [vmem:[#allocation3] ss:$0 sm:$0xff] }
 0x21c   : > { %292 = vst.msk [vmem:[#allocation4] sm:$0xff] %vm186_vm3, %v290_v44  ;;  %479 = vrcp.f32 %v472_v45  ;;  %v313_v49 = vand.u32 2147483648, %v472_v45  ;;  %v311_v51 = vand.u32 2147483647, %v472_v45  ;;  %vm307_vm5 = vweird.f32 %v472_v45 }
 0x21e   : > { %v314_v53 = vor.u32 1.1754944e-38, %v313_v49  ;;  %vm312_vm7 = vcmp.eq.f32.partialorder %v311_v51, 8.507059e+37 }
 0x222   : > { %v480_v46 = vpop.eup %479 }
 0x223   : > { %v303_v47 = vmul.f32 %v480_v46, %v472_v45  ;;  %vm308_vm4 = vweird.f32 %v480_v46  ;;  %v297_v55 = vld [vmem:[#allocation4] sm:$0xff] }
 0x224   : > { %vm309_vm6 = vmor %vm307_vm5, %vm308_vm4 }
 0x225   : > { %v304_v48 = vsub.f32 1.0, %v303_v47 }
 0x227   : > { %v305_v50 = vmul.f32 %v480_v46, %v304_v48 }
 0x229   : > { %v306_v52 = vadd.f32 %v480_v46, %v305_v50 }
 0x22b   : > { %v310_v54 = vsel %vm309_vm6, %v480_v46, %v306_v52 }
 0x22c   : > { %v315_v56 = vsel %vm312_vm7, %v314_v53, %v310_v54 }
 0x22d   : > { %v316_v57 = vmul.f32 %v315_v56, %v297_v55 }
 0x22f   : > { %317 = vst.msk [vmem:[%s178_s22] sm:$0xff] %vm186_vm3, %v316_v57 }
 0x230 PF: > { %s15_s14 = sadd.s32 1, %s561_s14   ;;  %s695_s9 = smov %s545_s10 }
 0x231   : > { %p12_p0 = scmp.ge.s32.totalorder %s15_s14, 4   ;;  %s696_s10 = smov %s549_s11 }
 0x232   : > { %s697_s11 = smov %s630_s21  ;;  %s698_s12 = smov %s557_s13 }
 0x233   : > { %s699_s13 = smov %s701_s16  ;;  %14 = sbr.rel (!%p12_p0) target bundleno = 4 (0x4), region = 76 }
 0x238   :  { %337 = vsyncpa [#allocation6], 1 }
 0x239   :  { %339 = vsyncpa [#allocation6 + $0x1], 1 }

</bundles_post_ra>
